<compile_context>
chip_gen: v6e
topology: v6e:2x2x1
jax: 0.10.0
libtpu: 0.0.40
codegen_flags: <defaults>
</compile_context>

<pallas_src>
import jax
import jax.numpy as jnp
from jax.experimental import pallas as pl
from jax.experimental.pallas import tpu as pltpu


# ----------------------------------------------------------------------------
# Preferred production path: the module is a pure identity; no kernel, no copy.
# ----------------------------------------------------------------------------
def identity_mlp_extractor(features: jax.Array):
    """Exact semantics of IdentityMLPExtractor.forward with zero overhead."""
    return features, features


# ----------------------------------------------------------------------------
# Pallas scaffold (kept for future fusion with real MLP compute).
# ----------------------------------------------------------------------------
def _copy_kernel(x_ref, vf_ref):
    # Whole-tile copy (VPU load/store); this is the point where fused MLP
    # compute would go.
    vf_ref[...] = x_ref[...]


_TILE_ROWS = 512   # rows per block (divisible by 8); 512x1024 f32 = 2 MiB/block
_TILE_COLS = 1024  # lane-dense: multiple of 128 -> unmasked full-lane stores


def _pallas_copy(features: jax.Array) -> jax.Array:
    """Tiled, pipelined HBM->VMEM->HBM copy of `features` (the vf branch)."""
    shape = features.shape
    dtype = features.dtype
    n = features.size

    # Lane-dense slab: pad the flat length to a multiple of 1024 and view it
    # as (rows, 1024). Pad/slice are cheap XLA ops outside the kernel and only
    # trigger when the element count is not already 1024-aligned.
    flat = features.reshape(-1)
    n_pad = ((n + _TILE_COLS - 1) // _TILE_COLS) * _TILE_COLS
    if n_pad != n:
        flat = jnp.pad(flat, (0, n_pad - n))
    rows = n_pad // _TILE_COLS
    x2d = flat.reshape(rows, _TILE_COLS)

    # Block rows: 512 (divisible by 8) for large inputs, or the full row
    # extent for small ones — both satisfy the (8,128) block constraint.
    # The last grid block may be partial; Pallas masks it automatically.
    block_rows = _TILE_ROWS if rows > _TILE_ROWS else rows
    grid = (pl.cdiv(rows, block_rows),)
    spec = pl.BlockSpec((block_rows, _TILE_COLS), lambda i: (i, 0))

    itemsize = jnp.dtype(dtype).itemsize
    vf2d = pl.pallas_call(
        _copy_kernel,
        out_shape=jax.ShapeDtypeStruct((rows, _TILE_COLS), dtype),
        grid=grid,
        in_specs=[spec],
        out_specs=spec,
        compiler_params=pltpu.CompilerParams(
            dimension_semantics=("parallel",),
        ),
        cost_estimate=pl.CostEstimate(
            flops=0,
            transcendentals=0,
            bytes_accessed=2 * n_pad * itemsize,
        ),
    )(x2d)

    vf_flat = vf2d.reshape(-1)
    if n_pad != n:
        vf_flat = vf_flat[:n]
    return vf_flat.reshape(shape)


def identity_mlp_extractor_pallas(features: jax.Array):
    """Pallas equivalent of IdentityMLPExtractor.forward.

    features: [batch, features_dim]
    returns:  (latent_pi, latent_vf), each equal to `features`.
    latent_pi is the input array itself (zero-copy); latent_vf is produced by
    the tiled Pallas copy kernel (fusion scaffold).
    """
    latent_pi = features
    latent_vf = _pallas_copy(features)
    return latent_pi, latent_vf


if __name__ == "__main__":
    import numpy as np

    # features_dim for the enkf_L63 policy is 60 (latent_dim_pi/vf = 60).
    batch = 8
    features_dim = 60

    key = jax.random.PRNGKey(0)
    features = jax.random.normal(key, (batch, features_dim), dtype=jnp.float32)
    features_host = np.asarray(features)

    # Preferred zero-overhead path.
    pi_fast, vf_fast = identity_mlp_extractor(features)

    # Pallas kernel path (scaffold); exercises the padded (480 -> 1024) layout.
    latent_pi, latent_vf = identity_mlp_extractor_pallas(features)
    jax.block_until_ready((latent_pi, latent_vf))

    assert latent_pi.shape == (batch, features_dim)
    assert latent_vf.shape == (batch, features_dim)
    assert np.array_equal(np.asarray(latent_pi), features_host)
    assert np.array_equal(np.asarray(latent_vf), features_host)
    assert np.array_equal(np.asarray(pi_fast), features_host)
    assert np.array_equal(np.asarray(vf_fast), features_host)

    print("KERNEL_OK")
</pallas_src>

<mosaic_0001>
module attributes {stable_mosaic.version = 11 : i64} {
  func.func @_copy_kernel(%arg0: i32, %arg1: memref<1x1024xf32, #tpu.memory_space<vmem>>, %arg2: memref<1x1024xf32, #tpu.memory_space<vmem>>) attributes {dimension_semantics = [#tpu.dimension_semantics<parallel>], iteration_bounds = array<i64: 1>, scalar_prefetch = 0 : i64, scratch_operands = 0 : i64, tpu.core_type = #tpu.core_type<tc>, window_params = [{transform_indices = @transform_0, window_bounds = array<i64: 1, 1024>}, {transform_indices = @transform_1, window_bounds = array<i64: 1, 1024>}]} {
    %c0 = arith.constant 0 : index
    %c0_0 = arith.constant 0 : index
    %0 = vector.load %arg1[%c0, %c0_0] : memref<1x1024xf32, #tpu.memory_space<vmem>>, vector<1x1024xf32>
    %c0_1 = arith.constant 0 : index
    %c0_2 = arith.constant 0 : index
    %1 = vector.load %arg2[%c0_1, %c0_2] : memref<1x1024xf32, #tpu.memory_space<vmem>>, vector<1x1024xf32>
    tpu.vector_store %arg2[%c0_1, %c0_2], %0 {strides = array<i32>} : memref<1x1024xf32, #tpu.memory_space<vmem>>, vector<1x1024xf32>,
    return
  }
  func.func @transform_0(%arg0: i32) -> (i32, i32) {
    %c0_i32 = arith.constant 0 : i32
    %c0_i32_0 = arith.constant 0 : i32
    return %arg0, %c0_i32 : i32, i32
  }
  func.func @transform_1(%arg0: i32) -> (i32, i32) {
    %c0_i32 = arith.constant 0 : i32
    %c0_i32_0 = arith.constant 0 : i32
    return %arg0, %c0_i32 : i32, i32
  }
}

</mosaic_0001>

<bundles_post_ra>
// kernel: tpu_custom_call.1
= control target key start
LH: loop header
LB: loop body
LE: loop exit
PB: predicated region body
PF: predicated region fallthrough
CT: control target
= control target key end

     0   :  { %6 = vsyncpa [#allocation3], 0  ;;  %s102_s0 = inlined_call_operand.hbm [shape: f32[1,1024], index: 0, kind: input, shape index: {}]   ;;  %s103_s1 = inlined_call_operand.hbm [shape: f32[1,1024], index: 1, kind: output, shape index: {}]  }
   0x1   :  { %7 = vsyncpa [#allocation4], 0  ;;  %s84_s6 = smov [#allocation2]  }
   0x2   :  { %s14_s7 = sshll.u32 %s84_s6, 4  ;;  %s15_s7 = int_to_ptr.vmem [resolvable:$true] %s14_s7 }
   0x3   :  { %s48_s8 = scalar_lea.vmem %s15_s7, 128  ;;  %p53_p1 = scmp.lt.s32.totalorder %s15_s7, %s15_s7 }
   0x4   :  { %p49_p0 = scmp.ne.s32.totalorder %s15_s7, %s48_s8  ;;  %p54_p2 = scmp.lt.s32.totalorder %s48_s8, %s48_s8 }
   0x6   :  { %p55_p3 = por %p54_p2, %p53_p1 }
   0x8   :  { %p56_p4 = pnand %p55_p3, %p49_p0 }
   0xa   :  { %59 = shalt.err (!%p56_p4)
}
   0xb   :  { %17 = dma.hbm_to_vmem [thread:$0]  %s102_s0, 128, %s15_s7, [#allocation3]  }
   0xc   :  { %80 = dma.done.wait [#allocation3], 128  }
   0xd   :  { %81 = vsyncadd [#allocation3], 4294967168  ;;  %s85_s11 = smov [#allocation5]   ;;  %v21_v0 = vld [vmem:[#allocation2] sm:$0xff] }
   0xe   :  { %s29_s12 = sshll.u32 %s85_s11, 4  ;;  %22 = vst [vmem:[#allocation5] sm:$0xff] %v21_v0  ;;  %s30_s12 = int_to_ptr.vmem [resolvable:$true] %s29_s12 }
   0xf   :  { %s60_s13 = scalar_lea.vmem %s30_s12, 128  ;;  %p65_p6 = scmp.lt.s32.totalorder %s30_s12, %s30_s12 }
  0x10   :  { %p61_p5 = scmp.ne.s32.totalorder %s30_s12, %s60_s13  ;;  %p66_p7 = scmp.lt.s32.totalorder %s60_s13, %s60_s13 }
  0x12   :  { %p67_p8 = por %p66_p7, %p65_p6 }
  0x14   :  { %p68_p9 = pnand %p67_p8, %p61_p5 }
  0x16   :  { %71 = shalt.err (!%p68_p9)
}
  0x17   :  { %32 = dma.vmem_to_hbm [thread:$0]  %s30_s12, 128, %s103_s1, [#allocation4]  }
  0x18   :  { %82 = dma.done.wait [#allocation4], 128  }
  0x19   :  { %83 = vsyncadd [#allocation4], 4294967168 }
  0x1a   :  { %36 = vsyncpa [#allocation3], 1 }
  0x1b   :  { %37 = vsyncpa [#allocation4], 1 }

</bundles_post_ra>
